<compile_context>
chip_gen: v7x
topology: tpu7x:2x2x1
jax: 0.10.0
libtpu: 0.0.40
codegen_flags: <defaults>
</compile_context>

<pallas_src>
import jax
import jax.numpy as jnp
from jax.experimental import pallas as pl
from jax.experimental.pallas import tpu as pltpu

EPS = 1e-5


# ----------------------------- Pallas kernels ------------------------------

def _dwpw_kernel(taps_ref, wdw_ref, wpw_ref, y_ref, stat_ref):
    # taps_ref: (9, TM, Cp)   shifted input taps for this row tile
    # wdw_ref:  (9, 1, Cp)    per-channel depthwise weights
    # wpw_ref:  (Cp, Cp_out)  pointwise 1x1 weights (zero-padded)
    # y_ref:    (TM, Cp_out)  pre-BN activation for this tile
    # stat_ref: (8, Cp_out)   row0 = partial sum, row1 = partial sum of squares
    # Depthwise 3x3 as a VPU multiply-accumulate (tiny per-channel K; the MXU
    # would be ~0% utilized for this part).
    acc = taps_ref[0] * wdw_ref[0]
    for t in range(1, taps_ref.shape[0]):
        acc = acc + taps_ref[t] * wdw_ref[t]
    # Pointwise 1x1 conv: lane-dense (TM, Cp) x (Cp, Cp_out) MXU matmul.
    y = jnp.dot(acc, wpw_ref[...], preferred_element_type=jnp.float32)
    y_ref[...] = y
    # Per-tile partial batch statistics (reduced across tiles in glue).
    s = jnp.sum(y, axis=0, keepdims=True)
    ss = jnp.sum(y * y, axis=0, keepdims=True)
    rows = jax.lax.broadcasted_iota(jnp.int32, stat_ref.shape, 0)
    stat_ref[...] = jnp.where(rows == 0, s, jnp.where(rows == 1, ss, 0.0))


def _bn_relu_kernel(y_ref, scale_ref, shift_ref, o_ref):
    # y: (TM, Cp); scale/shift: (1, Cp)  -> relu(y * scale + shift), lane-dense.
    o_ref[...] = jnp.maximum(y_ref[...] * scale_ref[...] + shift_ref[...], 0.0)


# ----------------------------- kernel wrappers ------------------------------

def _vmem_limit(est_bytes):
    # ~double-buffered working set + headroom, clamped to a range that is safe on
    # v5e/v6e (128 MiB physical VMEM) and v7x (64 MiB physical VMEM).
    return int(min(max(2 * est_bytes + (4 << 20), 32 << 20), 48 << 20))


def dwpw_call(taps, wdw, wpw, tm):
    T, Mp, Cp = taps.shape
    Cout_p = wpw.shape[1]
    ntiles = Mp // tm
    est = 4 * (T * tm * Cp + tm * Cout_p + 8 * Cout_p + T * Cp + Cp * Cout_p)
    return pl.pallas_call(
        _dwpw_kernel,
        out_shape=(
            jax.ShapeDtypeStruct((Mp, Cout_p), jnp.float32),
            jax.ShapeDtypeStruct((ntiles * 8, Cout_p), jnp.float32),
        ),
        grid=(ntiles,),
        in_specs=[
            pl.BlockSpec((T, tm, Cp), lambda i: (0, i, 0)),
            pl.BlockSpec((T, 1, Cp), lambda i: (0, 0, 0)),
            pl.BlockSpec((Cp, Cout_p), lambda i: (0, 0)),
        ],
        out_specs=(
            pl.BlockSpec((tm, Cout_p), lambda i: (i, 0)),
            pl.BlockSpec((8, Cout_p), lambda i: (i, 0)),
        ),
        compiler_params=pltpu.CompilerParams(
            dimension_semantics=("parallel",),
            vmem_limit_bytes=_vmem_limit(est)),
    )(taps, wdw, wpw)


def bn_relu_call(y, scale, shift, tm):
    Mp, Cp = y.shape
    ntiles = Mp // tm
    est = 4 * (2 * tm * Cp + 2 * Cp)
    return pl.pallas_call(
        _bn_relu_kernel,
        out_shape=jax.ShapeDtypeStruct((Mp, Cp), jnp.float32),
        grid=(ntiles,),
        in_specs=[
            pl.BlockSpec((tm, Cp), lambda i: (i, 0)),
            pl.BlockSpec((1, Cp), lambda i: (0, 0)),
            pl.BlockSpec((1, Cp), lambda i: (0, 0)),
        ],
        out_specs=pl.BlockSpec((tm, Cp), lambda i: (i, 0)),
        compiler_params=pltpu.CompilerParams(
            dimension_semantics=("parallel",),
            vmem_limit_bytes=_vmem_limit(est)),
    )(y, scale, shift)


# ------------------------------- glue (JAX) ---------------------------------

def _round_up(a, b):
    return ((a + b - 1) // b) * b


def _extract_taps_nhwc(x_nhwc, k, stride, pad):
    """Pure layout: 9 shifted strided views of the padded NHWC tensor -> (9, M, C)."""
    N, H, W, C = x_nhwc.shape
    xp = jnp.pad(x_nhwc, ((0, 0), (pad, pad), (pad, pad), (0, 0)))
    Ho = (H + 2 * pad - k) // stride + 1
    Wo = (W + 2 * pad - k) // stride + 1
    taps = []
    for ki in range(k):
        for kj in range(k):
            sl = xp[:, ki:ki + stride * Ho:stride, kj:kj + stride * Wo:stride, :]
            taps.append(sl.reshape(N * Ho * Wo, C))
    return jnp.stack(taps, axis=0), N * Ho * Wo, (N, Ho, Wo)


def _pad_rows(taps, tm):
    M = taps.shape[1]
    Mp = _round_up(M, tm)
    if Mp == M:
        return taps
    return jnp.pad(taps, ((0, 0), (0, Mp - M), (0, 0)))


def _pad2(a, rows_to, cols_to):
    return jnp.pad(a, ((0, rows_to - a.shape[0]), (0, cols_to - a.shape[1])))


def _dw_weight_rows(w, cp):  # (C,3,3) -> (9, 1, cp), tap order ki*3+kj
    C = w.shape[0]
    wt = jnp.transpose(w.reshape(C, 9), (1, 0))          # (9, C)
    wt = jnp.pad(wt, ((0, 0), (0, cp - C)))
    return wt.reshape(9, 1, cp)


def _bn_scale_shift(stat, m, gamma_p, beta_p):
    # stat: (ntiles*8, Cp); row 0/1 of each 8-row group = partial sum / sumsq.
    st = stat.reshape(-1, 8, stat.shape[-1])
    s = jnp.sum(st[:, 0, :], axis=0)
    ss = jnp.sum(st[:, 1, :], axis=0)
    mean = s / m
    var = jnp.maximum(ss / m - mean * mean, 0.0)          # biased var (PyTorch BN fwd)
    scale = gamma_p.reshape(-1) / jnp.sqrt(var + EPS)     # padded channels: gamma=0 -> 0
    shift = beta_p.reshape(-1) - mean * scale
    return scale.reshape(1, -1), shift.reshape(1, -1)


def sep_conv_forward(x, p, tm_rows=1024):
    """x: (N, Cin, H, W) f32 -> (N, Cout, H//2, W//2) f32.

    tm_rows: M-tile (rows per grid step); multiple of 8. 1024-4096 for real sizes.
    """
    assert tm_rows % 8 == 0
    N, Cin, H, W = x.shape
    Cout = p["pw2"].shape[1]
    CP = _round_up(max(Cin, Cout, 128), 128)              # lane-dense channel padding

    # NCHW -> NHWC once; channels zero-padded to CP.
    xt = jnp.transpose(x, (0, 2, 3, 1))
    xt = jnp.pad(xt, ((0, 0), (0, 0), (0, 0), (0, CP - Cin)))

    # Padded weights / BN affine params (padded gamma=0, beta=0 keep pad lanes at 0).
    wdw1 = _dw_weight_rows(p["dw1"], CP)
    wpw1 = _pad2(p["pw1"], CP, CP)
    wdw2 = _dw_weight_rows(p["dw2"], CP)
    wpw2 = _pad2(p["pw2"], CP, CP)
    g1, b1 = _pad2(p["g1"], 1, CP), _pad2(p["b1"], 1, CP)
    g2, b2 = _pad2(p["g2"], 1, CP), _pad2(p["b2"], 1, CP)

    # ---- stage 1+2: fused dw3x3(s=2) + pw1x1 + stats, then BN+ReLU ----------
    taps, M, (N, Ho, Wo) = _extract_taps_nhwc(xt, 3, 2, 1)
    tm = min(tm_rows, _round_up(M, 8))
    taps = _pad_rows(taps, tm)
    y, stat = dwpw_call(taps, wdw1, wpw1, tm)
    scale, shift = _bn_scale_shift(stat, M, g1, b1)
    h = bn_relu_call(y, scale, shift, tm)                 # (Mp, CP)

    # ---- stage 3+4: fused dw3x3(s=1) + pw1x1 + stats, then BN+ReLU ----------
    h_nhwc = h[:M].reshape(N, Ho, Wo, CP)                 # stays NHWC (no NCHW round trip)
    taps2, M2, _ = _extract_taps_nhwc(h_nhwc, 3, 1, 1)
    taps2 = _pad_rows(taps2, tm)
    y2, stat2 = dwpw_call(taps2, wdw2, wpw2, tm)
    scale2, shift2 = _bn_scale_shift(stat2, M2, g2, b2)
    out = bn_relu_call(y2, scale2, shift2, tm)            # (Mp, CP)

    out = out[:M2, :Cout].reshape(N, Ho, Wo, Cout)
    return jnp.transpose(out, (0, 3, 1, 2))               # NCHW once at the very end


# --------------------------- pure-JAX reference ------------------------------

def _ref_forward(x, p):
    def dw_conv(x, w, stride):
        C = w.shape[0]
        return jax.lax.conv_general_dilated(
            x, w.reshape(C, 1, 3, 3), (stride, stride), ((1, 1), (1, 1)),
            dimension_numbers=("NCHW", "OIHW", "NCHW"), feature_group_count=C)

    def pw_conv(x, wm):  # wm: (Cin, Cout) stored as W^T
        w = jnp.transpose(wm, (1, 0)).reshape(wm.shape[1], wm.shape[0], 1, 1)
        return jax.lax.conv_general_dilated(
            x, w, (1, 1), ((0, 0), (0, 0)),
            dimension_numbers=("NCHW", "OIHW", "NCHW"))

    def bn_relu(x, g, b):
        mean = x.mean(axis=(0, 2, 3), keepdims=True)
        var = x.var(axis=(0, 2, 3), keepdims=True)
        y = (x - mean) / jnp.sqrt(var + EPS)
        y = y * g.reshape(1, -1, 1, 1) + b.reshape(1, -1, 1, 1)
        return jnp.maximum(y, 0.0)

    h = dw_conv(x, p["dw1"], 2)
    h = pw_conv(h, p["pw1"])
    h = bn_relu(h, p["g1"], p["b1"])
    h = dw_conv(h, p["dw2"], 1)
    h = pw_conv(h, p["pw2"])
    h = bn_relu(h, p["g2"], p["b2"])
    return h


# ---------------------------------- main -------------------------------------

if __name__ == "__main__":
    N, Cin, H, W, Cout = 2, 4, 16, 16, 8
    key = jax.random.PRNGKey(0)
    ks = jax.random.split(key, 5)

    x = jax.random.normal(ks[0], (N, Cin, H, W), jnp.float32)

    # Parameter shapes match the PyTorch module:
    #  dw1/dw2: depthwise (Cin,3,3); pw1: (Cin,Cin)=W^T; pw2: (Cin,Cout)=W^T;
    #  BN affine: gamma=1, beta=0.
    params = {
        "dw1": jax.random.normal(ks[1], (Cin, 3, 3), jnp.float32) * 0.3,
        "pw1": jax.random.normal(ks[2], (Cin, Cin), jnp.float32) * 0.3,
        "g1": jnp.ones((1, Cin), jnp.float32),
        "b1": jnp.zeros((1, Cin), jnp.float32),
        "dw2": jax.random.normal(ks[3], (Cin, 3, 3), jnp.float32) * 0.3,
        "pw2": jax.random.normal(ks[4], (Cin, Cout), jnp.float32) * 0.3,
        "g2": jnp.ones((1, Cout), jnp.float32),
        "b2": jnp.zeros((1, Cout), jnp.float32),
    }

    # tm_rows=64 exercises the multi-tile grid path at these toy shapes
    # (M = 2*8*8 = 128 rows -> 2 tiles); use 1024-4096 for production sizes.
    out = sep_conv_forward(x, params, tm_rows=64)
    out = jax.block_until_ready(out)

    assert out.shape == (N, Cout, H // 2, W // 2), out.shape

    ref = _ref_forward(x, params)
    err = float(jnp.max(jnp.abs(out - ref)))
    assert err < 1e-3, f"max abs error vs reference: {err}"

    print("KERNEL_OK")
</pallas_src>

<mosaic_0001>
module attributes {stable_mosaic.version = 11 : i64} {
  func.func @_dwpw_kernel(%arg0: i32, %arg1: memref<9x64x128xf32, #tpu.memory_space<vmem>>, %arg2: memref<9x1x128xf32, #tpu.memory_space<vmem>>, %arg3: memref<128x128xf32, #tpu.memory_space<vmem>>, %arg4: memref<64x128xf32, #tpu.memory_space<vmem>>, %arg5: memref<8x128xf32, #tpu.memory_space<vmem>>) attributes {dimension_semantics = [#tpu.dimension_semantics<parallel>], iteration_bounds = array<i64: 2>, scalar_prefetch = 0 : i64, scratch_operands = 0 : i64, tpu.core_type = #tpu.core_type<tc>, window_params = [{transform_indices = @transform_0, window_bounds = array<i64: 9, 64, 128>}, {pipeline_mode = #tpu.pipeline_mode<synchronous>, transform_indices = @transform_1, window_bounds = array<i64: 9, 1, 128>}, {pipeline_mode = #tpu.pipeline_mode<synchronous>, transform_indices = @transform_2, window_bounds = array<i64: 128, 128>}, {transform_indices = @transform_3, window_bounds = array<i64: 64, 128>}, {transform_indices = @transform_4, window_bounds = array<i64: 8, 128>}]} {
    %c0 = arith.constant 0 : index
    %c0_0 = arith.constant 0 : index
    %c0_1 = arith.constant 0 : index
    %0 = vector.load %arg1[%c0, %c0_0, %c0_1] : memref<9x64x128xf32, #tpu.memory_space<vmem>>, vector<1x64x128xf32>
    %1 = vector.shape_cast %0 : vector<1x64x128xf32> to vector<64x128xf32>
    %c0_2 = arith.constant 0 : index
    %c0_3 = arith.constant 0 : index
    %c0_4 = arith.constant 0 : index
    %2 = vector.load %arg2[%c0_2, %c0_3, %c0_4] : memref<9x1x128xf32, #tpu.memory_space<vmem>>, vector<1x1x128xf32>
    %3 = vector.shape_cast %2 : vector<1x1x128xf32> to vector<1x128xf32>
    %4 = vector.broadcast %3 : vector<1x128xf32> to vector<64x128xf32>
    %5 = arith.mulf %1, %4 : vector<64x128xf32>
    %c1 = arith.constant 1 : index
    %c0_5 = arith.constant 0 : index
    %c0_6 = arith.constant 0 : index
    %6 = vector.load %arg1[%c1, %c0_5, %c0_6] : memref<9x64x128xf32, #tpu.memory_space<vmem>>, vector<1x64x128xf32>
    %7 = vector.shape_cast %6 : vector<1x64x128xf32> to vector<64x128xf32>
    %c1_7 = arith.constant 1 : index
    %c0_8 = arith.constant 0 : index
    %c0_9 = arith.constant 0 : index
    %8 = vector.load %arg2[%c1_7, %c0_8, %c0_9] : memref<9x1x128xf32, #tpu.memory_space<vmem>>, vector<1x1x128xf32>
    %9 = vector.shape_cast %8 : vector<1x1x128xf32> to vector<1x128xf32>
    %10 = vector.broadcast %9 : vector<1x128xf32> to vector<64x128xf32>
    %11 = arith.mulf %7, %10 : vector<64x128xf32>
    %12 = arith.addf %5, %11 : vector<64x128xf32>
    %c2 = arith.constant 2 : index
    %c0_10 = arith.constant 0 : index
    %c0_11 = arith.constant 0 : index
    %13 = vector.load %arg1[%c2, %c0_10, %c0_11] : memref<9x64x128xf32, #tpu.memory_space<vmem>>, vector<1x64x128xf32>
    %14 = vector.shape_cast %13 : vector<1x64x128xf32> to vector<64x128xf32>
    %c2_12 = arith.constant 2 : index
    %c0_13 = arith.constant 0 : index
    %c0_14 = arith.constant 0 : index
    %15 = vector.load %arg2[%c2_12, %c0_13, %c0_14] : memref<9x1x128xf32, #tpu.memory_space<vmem>>, vector<1x1x128xf32>
    %16 = vector.shape_cast %15 : vector<1x1x128xf32> to vector<1x128xf32>
    %17 = vector.broadcast %16 : vector<1x128xf32> to vector<64x128xf32>
    %18 = arith.mulf %14, %17 : vector<64x128xf32>
    %19 = arith.addf %12, %18 : vector<64x128xf32>
    %c3 = arith.constant 3 : index
    %c0_15 = arith.constant 0 : index
    %c0_16 = arith.constant 0 : index
    %20 = vector.load %arg1[%c3, %c0_15, %c0_16] : memref<9x64x128xf32, #tpu.memory_space<vmem>>, vector<1x64x128xf32>
    %21 = vector.shape_cast %20 : vector<1x64x128xf32> to vector<64x128xf32>
    %c3_17 = arith.constant 3 : index
    %c0_18 = arith.constant 0 : index
    %c0_19 = arith.constant 0 : index
    %22 = vector.load %arg2[%c3_17, %c0_18, %c0_19] : memref<9x1x128xf32, #tpu.memory_space<vmem>>, vector<1x1x128xf32>
    %23 = vector.shape_cast %22 : vector<1x1x128xf32> to vector<1x128xf32>
    %24 = vector.broadcast %23 : vector<1x128xf32> to vector<64x128xf32>
    %25 = arith.mulf %21, %24 : vector<64x128xf32>
    %26 = arith.addf %19, %25 : vector<64x128xf32>
    %c4 = arith.constant 4 : index
    %c0_20 = arith.constant 0 : index
    %c0_21 = arith.constant 0 : index
    %27 = vector.load %arg1[%c4, %c0_20, %c0_21] : memref<9x64x128xf32, #tpu.memory_space<vmem>>, vector<1x64x128xf32>
    %28 = vector.shape_cast %27 : vector<1x64x128xf32> to vector<64x128xf32>
    %c4_22 = arith.constant 4 : index
    %c0_23 = arith.constant 0 : index
    %c0_24 = arith.constant 0 : index
    %29 = vector.load %arg2[%c4_22, %c0_23, %c0_24] : memref<9x1x128xf32, #tpu.memory_space<vmem>>, vector<1x1x128xf32>
    %30 = vector.shape_cast %29 : vector<1x1x128xf32> to vector<1x128xf32>
    %31 = vector.broadcast %30 : vector<1x128xf32> to vector<64x128xf32>
    %32 = arith.mulf %28, %31 : vector<64x128xf32>
    %33 = arith.addf %26, %32 : vector<64x128xf32>
    %c5 = arith.constant 5 : index
    %c0_25 = arith.constant 0 : index
    %c0_26 = arith.constant 0 : index
    %34 = vector.load %arg1[%c5, %c0_25, %c0_26] : memref<9x64x128xf32, #tpu.memory_space<vmem>>, vector<1x64x128xf32>
    %35 = vector.shape_cast %34 : vector<1x64x128xf32> to vector<64x128xf32>
    %c5_27 = arith.constant 5 : index
    %c0_28 = arith.constant 0 : index
    %c0_29 = arith.constant 0 : index
    %36 = vector.load %arg2[%c5_27, %c0_28, %c0_29] : memref<9x1x128xf32, #tpu.memory_space<vmem>>, vector<1x1x128xf32>
    %37 = vector.shape_cast %36 : vector<1x1x128xf32> to vector<1x128xf32>
    %38 = vector.broadcast %37 : vector<1x128xf32> to vector<64x128xf32>
    %39 = arith.mulf %35, %38 : vector<64x128xf32>
    %40 = arith.addf %33, %39 : vector<64x128xf32>
    %c6 = arith.constant 6 : index
    %c0_30 = arith.constant 0 : index
    %c0_31 = arith.constant 0 : index
    %41 = vector.load %arg1[%c6, %c0_30, %c0_31] : memref<9x64x128xf32, #tpu.memory_space<vmem>>, vector<1x64x128xf32>
    %42 = vector.shape_cast %41 : vector<1x64x128xf32> to vector<64x128xf32>
    %c6_32 = arith.constant 6 : index
    %c0_33 = arith.constant 0 : index
    %c0_34 = arith.constant 0 : index
    %43 = vector.load %arg2[%c6_32, %c0_33, %c0_34] : memref<9x1x128xf32, #tpu.memory_space<vmem>>, vector<1x1x128xf32>
    %44 = vector.shape_cast %43 : vector<1x1x128xf32> to vector<1x128xf32>
    %45 = vector.broadcast %44 : vector<1x128xf32> to vector<64x128xf32>
    %46 = arith.mulf %42, %45 : vector<64x128xf32>
    %47 = arith.addf %40, %46 : vector<64x128xf32>
    %c7 = arith.constant 7 : index
    %c0_35 = arith.constant 0 : index
    %c0_36 = arith.constant 0 : index
    %48 = vector.load %arg1[%c7, %c0_35, %c0_36] : memref<9x64x128xf32, #tpu.memory_space<vmem>>, vector<1x64x128xf32>
    %49 = vector.shape_cast %48 : vector<1x64x128xf32> to vector<64x128xf32>
    %c7_37 = arith.constant 7 : index
    %c0_38 = arith.constant 0 : index
    %c0_39 = arith.constant 0 : index
    %50 = vector.load %arg2[%c7_37, %c0_38, %c0_39] : memref<9x1x128xf32, #tpu.memory_space<vmem>>, vector<1x1x128xf32>
    %51 = vector.shape_cast %50 : vector<1x1x128xf32> to vector<1x128xf32>
    %52 = vector.broadcast %51 : vector<1x128xf32> to vector<64x128xf32>
    %53 = arith.mulf %49, %52 : vector<64x128xf32>
    %54 = arith.addf %47, %53 : vector<64x128xf32>
    %c8 = arith.constant 8 : index
    %c0_40 = arith.constant 0 : index
    %c0_41 = arith.constant 0 : index
    %55 = vector.load %arg1[%c8, %c0_40, %c0_41] : memref<9x64x128xf32, #tpu.memory_space<vmem>>, vector<1x64x128xf32>
    %56 = vector.shape_cast %55 : vector<1x64x128xf32> to vector<64x128xf32>
    %c8_42 = arith.constant 8 : index
    %c0_43 = arith.constant 0 : index
    %c0_44 = arith.constant 0 : index
    %57 = vector.load %arg2[%c8_42, %c0_43, %c0_44] : memref<9x1x128xf32, #tpu.memory_space<vmem>>, vector<1x1x128xf32>
    %58 = vector.shape_cast %57 : vector<1x1x128xf32> to vector<1x128xf32>
    %59 = vector.broadcast %58 : vector<1x128xf32> to vector<64x128xf32>
    %60 = arith.mulf %56, %59 : vector<64x128xf32>
    %61 = arith.addf %54, %60 : vector<64x128xf32>
    %c0_45 = arith.constant 0 : index
    %c0_46 = arith.constant 0 : index
    %62 = vector.load %arg3[%c0_45, %c0_46] : memref<128x128xf32, #tpu.memory_space<vmem>>, vector<128x128xf32>
    %cst = arith.constant dense<0.000000e+00> : vector<64x128xf32>
    %63 = tpu.matmul %61, %62, %cst {dimension_numbers = #tpu.dot_dimension_numbers<[1], [0], [0], [1], [0, 0, 1, 1], [], []>} : vector<64x128xf32>, vector<128x128xf32>, vector<64x128xf32> -> vector<64x128xf32>
    %c0_47 = arith.constant 0 : index
    %c0_48 = arith.constant 0 : index
    %64 = vector.load %arg4[%c0_47, %c0_48] : memref<64x128xf32, #tpu.memory_space<vmem>>, vector<64x128xf32>
    tpu.vector_store %arg4[%c0_47, %c0_48], %63 {strides = array<i32>} : memref<64x128xf32, #tpu.memory_space<vmem>>, vector<64x128xf32>,
    %cst_49 = arith.constant dense<0.000000e+00> : vector<128xf32>
    %65 = vector.multi_reduction <add>, %63, %cst_49 [0] : vector<64x128xf32> to vector<128xf32>
    %66 = vector.shape_cast %65 : vector<128xf32> to vector<1x128xf32>
    %67 = arith.mulf %63, %63 : vector<64x128xf32>
    %cst_50 = arith.constant dense<0.000000e+00> : vector<128xf32>
    %68 = vector.multi_reduction <add>, %67, %cst_50 [0] : vector<64x128xf32> to vector<128xf32>
    %69 = vector.shape_cast %68 : vector<128xf32> to vector<1x128xf32>
    %70 = tpu.iota {dimensions = array<i32: 0>} : vector<8x128xi32>
    %c0_i32 = arith.constant 0 : i32
    %71 = vector.broadcast %c0_i32 : i32 to vector<8x128xi32>
    %72 = arith.cmpi eq, %70, %71 : vector<8x128xi32>
    %c1_i32 = arith.constant 1 : i32
    %73 = vector.broadcast %c1_i32 : i32 to vector<8x128xi32>
    %74 = arith.cmpi eq, %70, %73 : vector<8x128xi32>
    %cst_51 = arith.constant 0.000000e+00 : f32
    %75 = vector.shape_cast %69 : vector<1x128xf32> to vector<1x128xf32>
    %76 = vector.broadcast %75 : vector<1x128xf32> to vector<8x128xf32>
    %77 = vector.broadcast %cst_51 : f32 to vector<8x128xf32>
    %78 = arith.select %74, %76, %77 : vector<8x128xi1>, vector<8x128xf32>
    %79 = vector.shape_cast %66 : vector<1x128xf32> to vector<1x128xf32>
    %80 = vector.broadcast %79 : vector<1x128xf32> to vector<8x128xf32>
    %81 = arith.select %72, %80, %78 : vector<8x128xi1>, vector<8x128xf32>
    %c0_52 = arith.constant 0 : index
    %c0_53 = arith.constant 0 : index
    %82 = vector.load %arg5[%c0_52, %c0_53] : memref<8x128xf32, #tpu.memory_space<vmem>>, vector<8x128xf32>
    tpu.vector_store %arg5[%c0_52, %c0_53], %81 {strides = array<i32>} : memref<8x128xf32, #tpu.memory_space<vmem>>, vector<8x128xf32>,
    return
  }
  func.func @transform_0(%arg0: i32) -> (i32, i32, i32) {
    %c0_i32 = arith.constant 0 : i32
    %c0_i32_0 = arith.constant 0 : i32
    %c0_i32_1 = arith.constant 0 : i32
    return %c0_i32, %arg0, %c0_i32_0 : i32, i32, i32
  }
  func.func @transform_1(%arg0: i32) -> (i32, i32, i32) {
    %c0_i32 = arith.constant 0 : i32
    %c0_i32_0 = arith.constant 0 : i32
    %c0_i32_1 = arith.constant 0 : i32
    %c0_i32_2 = arith.constant 0 : i32
    return %c0_i32, %c0_i32_0, %c0_i32_1 : i32, i32, i32
  }
  func.func @transform_2(%arg0: i32) -> (i32, i32) {
    %c0_i32 = arith.constant 0 : i32
    %c0_i32_0 = arith.constant 0 : i32
    %c0_i32_1 = arith.constant 0 : i32
    return %c0_i32, %c0_i32_0 : i32, i32
  }
  func.func @transform_3(%arg0: i32) -> (i32, i32) {
    %c0_i32 = arith.constant 0 : i32
    %c0_i32_0 = arith.constant 0 : i32
    return %arg0, %c0_i32 : i32, i32
  }
  func.func @transform_4(%arg0: i32) -> (i32, i32) {
    %c0_i32 = arith.constant 0 : i32
    %c0_i32_0 = arith.constant 0 : i32
    return %arg0, %c0_i32 : i32, i32
  }
}

</mosaic_0001>

<bundles_post_ra>
// kernel: tpu_custom_call.1
= control target key start
LH: loop header
LB: loop body
LE: loop exit
PB: predicated region body
PF: predicated region fallthrough
CT: control target
= control target key end

     0   :  { %10 = vsyncpa [#allocation3], 0  ;;  %s1830_s0 = inlined_call_operand.hbm [shape: f32[9,128,128], index: 0, kind: input, shape index: {}]   ;;  %s1831_s1 = inlined_call_operand.hbm [shape: f32[9,1,128], index: 1, kind: input, shape index: {}]   ;;  %s1832_s2 = inlined_call_operand.hbm [shape: f32[128,128], index: 2, kind: input, shape index: {}]   ;;  %s1833_s3 = inlined_call_operand.hbm [shape: f32[128,128], index: 3, kind: output, shape index: {0}]   ;;  %s1834_s4 = inlined_call_operand.hbm [shape: f32[16,128], index: 4, kind: output, shape index: {1}]  }
   0x1   :  { %12 = vsyncpa [#allocation3 + $0x1], 0 }
   0x2   :  { %13 = vsyncpa [#allocation6], 0 }
   0x3   :  { %14 = vsyncpa [#allocation4], 0 }
   0x4   :  { %16 = vsyncpa [#allocation4 + $0x1], 0 }
   0x5   :  { %17 = vsyncpa [#allocation10], 0 }
   0x6   :  { %19 = vsyncpa [#allocation10 + $0x1], 0  ;;  %s1395_s15 = smov 0   ;;  %s1397_s16 = smov 0  }
   0x7   :  { %s1399_s17 = smov 0   ;;  %s1401_s18 = smov 0  }
   0x8 LB: > { %s1416_s19 = sadd.s32 4294967295, %s1353_s18   ;;  %s896_s20 = sadd.s32 4294967294, %s1353_s18   ;;  %s1353_s18 = sphi %s1401_s18, %s1856_s18   ;;  %s1349_s17 = sphi %s1399_s17, %s1855_s17   ;;  %s1345_s16 = sphi %s1397_s16, %s1854_s16   ;;  %s1341_s15 = sphi %s1395_s15, %s1853_s15  }
   0x9   : > { %s1420_s21 = sadd.s32 1, %s1353_s18   ;;  %s32_s22 = sadd.s32 1, %s1349_s17 }
   0xa   : > { %s29_s23 = ssub.s32 %s1353_s18, %s1420_s21  ;;  %p39_p0 = scmp.ne.s32.totalorder %s1349_s17, %s1345_s16 }
   0xb   : > { %p30_p1 = scmp.eq.s32.totalorder %s29_s23, 0  ;;  %p40_p2 = scmp.eq.s32.totalorder %s1353_s18, 0 }
   0xc   : > { %p45_p3 = scmp.ne.s32.totalorder %s1345_s16, %s1341_s15  ;;  %p1835_p4 = scmp.eq.s32.totalorder %s1416_s19, 0 }
   0xd   : > { %s1432_s24 = scalar_select %p30_p1, %s1349_s17, %s32_s22  }
   0xe   : > { %p1434_p5 = por %p40_p2, %p39_p0  ;;  %p1440_p6 = por %p1835_p4, %p45_p3 }
   0xf   : > { %p111_p7 = scmp.eq.s32.totalorder %s1416_s19, 1  ;;  %p117_p8 = scmp.eq.s32.totalorder %s896_s20, 1 }
  0x10   : > { %s1840_s25 = scalar_select %p1434_p5, 1, 0 }
  0x11   : > { %s1841_s26 = scalar_select %p1440_p6, 1, 0 }
  0x12   : > { %p897_p9 = scmp.ge.s32.totalorder %s1353_s18, 1  ;;  %p150_p10 = scmp.lt.s32.totalorder %s1353_s18, 3 }
  0x13   : > { %p1447_p11 = por %p111_p7, %p39_p0  ;;  %p1451_p12 = por %p117_p8, %p45_p3 }
  0x14   : > { %p1455_p13 = pnand %p897_p9, %p150_p10  ;;  %s1355_s30 = smov [#allocation5]  }
  0x15   : > { %s1842_s27 = scalar_select %p1447_p11, 1, 0 }
  0x16   : > { %s1843_s28 = scalar_select %p1451_p12, 1, 0 }
  0x17   : > { %s1844_s29 = scalar_select %p1455_p13, 1, 0 }
  0x18   : > { %p1131_p1 = pneg %p1455_p13  ;;  %s162_s5 = sshll.u32 %s1355_s30, 4  ;;  %s163_s5 = int_to_ptr.vmem [resolvable:$true] %s162_s5 }
  0x19   : > { %s1356_s7 = smov [#allocation7]   ;;  %s1195_s11 = scalar_lea.hbm %s1831_s1, 144 }
  0x1a   : > { %p1463_p2 = pnand %p1131_p1, %p1835_p4  ;;  %s175_s8 = sshll.u32 %s1356_s7, 4  ;;  %s1467_s8 = int_to_ptr.vmem [resolvable:$true] %s175_s8 }
  0x1b   : > { %p1196_p0 = scmp.ne.s32.totalorder %s1831_s1, %s1195_s11  ;;  %p1202_p9 = scmp.lt.u32.totalorder %s1195_s11, %s1831_s1 }
  0x1c   : > { %p1197_p3 = pneg %p1463_p2 }
  0x1e   : > { %p1198_p7 = pnand %p1197_p3, %p1196_p0 }
  0x20   : > { %p1199_p8 = pneg %p1198_p7 }
  0x22   : > { %p1204_p10 = pnand %p1202_p9, %p1199_p8 }
  0x24   : > { %1207 = shalt.err (!%p1204_p10)
}
  0x25   : > { %s1208_s22 = scalar_lea.vmem %s163_s5, 144  ;;  %s1215_s23 = scalar_lea.vmem %s163_s5, 160 }
  0x26   : > { %p1209_p1 = scmp.ne.s32.totalorder %s163_s5, %s1208_s22  ;;  %p1216_p11 = scmp.lt.s32.totalorder %s163_s5, %s163_s5 }
  0x27   : > { %p1217_p6 = scmp.lt.s32.totalorder %s1215_s23, %s1208_s22 }
  0x28   : > { %p1211_p4 = pnand %p1209_p1, %p1197_p3 }
  0x29   : > { %p1218_p13 = por %p1217_p6, %p1216_p11 }
  0x2a   : > { %p1212_p12 = pneg %p1211_p4 }
  0x2c   : > { %p1219_p5 = pnand %p1218_p13, %p1212_p12 }
  0x2e   : > { %1222 = shalt.err (!%p1219_p5)
}
  0x2f   : > { %s1357_s30 = smov 16   ;;  %s1358_s7 = smov 1  }
  0x30   : > { %1134 = dma.hbm_to_vmem [thread:$0]  (!%p1463_p2), %s1831_s1, 144, %s163_s5, [#allocation6], %s1357_s30, %s1357_s30, %s1358_s7  }
  0x31   : > { %s1223_s13 = scalar_lea.hbm %s1832_s2, 2048 }
  0x32   : > { %p1224_p4 = scmp.ne.s32.totalorder %s1832_s2, %s1223_s13  ;;  %p1230_p11 = scmp.lt.u32.totalorder %s1223_s13, %s1832_s2 }
  0x34   : > { %p1226_p5 = pnand %p1224_p4, %p1197_p3 }
  0x36   : > { %p1227_p6 = pneg %p1226_p5 }
  0x38   : > { %p1232_p12 = pnand %p1230_p11, %p1227_p6 }
  0x3a   : > { %1235 = shalt.err (!%p1232_p12)
}
  0x3b   : > { %s1236_s5 = scalar_lea.vmem %s1467_s8, 2048  ;;  %p1244_p8 = scmp.lt.s32.totalorder %s1467_s8, %s1467_s8 }
  0x3c   : > { %p1237_p13 = scmp.ne.s32.totalorder %s1467_s8, %s1236_s5  ;;  %p1245_p9 = scmp.lt.s32.totalorder %s1236_s5, %s1236_s5 }
  0x3e   : > { %p1239_p0 = pnand %p1237_p13, %p1197_p3  ;;  %p1246_p10 = por %p1245_p9, %p1244_p8 }
  0x40   : > { %p1240_p7 = pneg %p1239_p0 }
  0x42   : > { %p1247_p1 = pnand %p1246_p10, %p1240_p7 }
  0x44   : > { %1250 = shalt.err (!%p1247_p1)
}
  0x45   : > { %s1359_s30 = smov 128   ;;  %s1360_s7 = smov 8  }
  0x46   : > { %1137 = dma.hbm_to_vmem [thread:$0]  (!%p1463_p2), %s1832_s2, 2048, %s1467_s8, [#allocation6], %s1359_s30, %s1359_s30, %s1360_s7  }
  0x47   : > { %p900_p4 = scmp.ge.s32.totalorder %s1353_s18, 2 }
  0x49   : > { %185 = sbr.rel (%p900_p4) target bundleno = 96 (0x60), region = 24 }
  0x50   : > { %s189_s11 = sand.u32 1, %s1349_s17   ;;  %s990_s6 = sshll.u32 %s1353_s18, 10 }
  0x51   : > { %s1108_s12 = smul.u32 576, %s189_s11  ;;  %s1361_s13 = smov 2048  }
  0x52   : > { %p1846_p3 = scmp.ne.s32.totalorder %s1840_s25, 0  ;;  %s1362_s23 = smov 1024  }
  0x53   : > { %s193_s20 = scalar_lea.vmem [#allocation2], %s1108_s12  ;;  %s1363_s5 = smov 8  }
  0x54   : > { %1115 = sst [smem:[#allocation12]] (%p1846_p3), %s1361_s13  ;;  %s212_s22 = sshll.u32 %s193_s20, 4  ;;  %s213_s22 = int_to_ptr.vmem [resolvable:$true] %s212_s22 }
  0x55   : > { %s1114_s8 = scalar_select %p1846_p3, [#allocation0], [#allocation13] }
  0x56   : > { %1116 = sst [smem:[#allocation12 + $0x1]] (%p1846_p3), %s1362_s23  ;;  %s199_s9 = scalar_lea.hbm %s1830_s0, %s990_s6 }
  0x57   : > { %s204_s14 = sld [smem:[%s1114_s8]]   ;;  %s1364_s10 = smov 128  }
  0x58   : > { %1117 = sst [smem:[#allocation12 + $0x2]] (%p1846_p3), %s1363_s5  ;;  %s190_s8 = scalar_lea.sflag [#allocation3], %s189_s11 }
  0x59   : > { %1118 = sst [smem:[#allocation12 + $0x3]] (%p1846_p3), %s1364_s10  ;;  %s1365_s20 = smov [#allocation11]  }
  0x5a   : > { %1119 = sst [smem:[#allocation12 + $0x4]] (%p1846_p3), %s1364_s10 }
  0x5b   : > { %1120 = sst [smem:[#allocation12 + $0x5]] (%p1846_p3), %s1363_s5 }
  0x5d   : > { %s903_s12 = sshll.u32 %s204_s14, 26 }
  0x5e   : > { %s904_s13 = sadd.s32 134217728, %s903_s12 }
  0x5f   : > { %1121 = dma.general (%p1846_p3), %s199_s9, 9216, %s213_s22, %s190_s8, %s1365_s20, [#allocation12], %s904_s13, 0  }
  0x60 PF: > { %p1847_p2 = scmp.ne.s32.totalorder %s1844_s29, 0 }
  0x61   : > { %s1543_s6 = sand.u32 (!%p1847_p2), 1, %s1345_s16   ;;  %p1848_p5 = scmp.ne.s32.totalorder (!%p1847_p2), %s1841_s26, 0 }
  0x62   : > { %237 = sbr.rel (%p1847_p2) target bundleno = 421 (0x1a5), region = 32  ;;  %s240_s30 = scalar_lea.sflag (!%p1847_p2), [#allocation3], %s1543_s6 }
  0x63   : > { %s1109_s23 = smul.u32 (!%p1847_p2), 576, %s1543_s6 }
  0x65   : > { %s1547_s7 = scalar_lea.vmem (!%p1847_p2), [#allocation2], %s1109_s23 }
  0x69   : > { %1324 = dma.done.wait (%p1848_p5), %s240_s30, 9216  }
  0x6a   : > { %1326 = vsyncadd (%p1848_p5), %s240_s30, 4294958080  ;;  %p1849_p6 = scmp.eq.s32.totalorder %s1416_s19, 0 }
  0x6c   : > { %1328 = dma.done.wait (%p1849_p6), [#allocation6], 2192   ;;  %p1850_p11 = pmov %p1849_p6 }
  0x6d   : > { %v570_v0 = vld [vmem:[#allocation7] sm:$0xff]  ;;  %v571_v1 = vld [vmem:[#allocation7 + $0x8] sm:$0xff]  ;;  %v572_v2 = vld [vmem:[#allocation7 + $0x10] sm:$0xff]  ;;  %s908_s25 = sshll.u32 %s1543_s6, 6  ;;  %s991_s11 = sshll.u32 %s1416_s19, 10 }
  0x6e   : > { %1330 = vsyncadd (%p1850_p11), [#allocation6], 4294965104  ;;  %v1060_v3 = vpack.c.bf16 %v571_v1, %v570_v0  ;;  %v573_v4 = vld [vmem:[#allocation7 + $0x18] sm:$0xff]  ;;  %v574_v6 = vld [vmem:[#allocation7 + $0x20] sm:$0xff]  ;;  %s1738_s26 = scalar_lea.vmem [#allocation8], %s908_s25  ;;  %s1753_s5 = scalar_lea.hbm %s1833_s3, %s991_s11 }
  0x6f   : > { %v1064_v5 = vpack.c.bf16 %v573_v4, %v572_v2  ;;  %v575_v7 = vld [vmem:[#allocation7 + $0x28] sm:$0xff]  ;;  %v576_v8 = vld [vmem:[#allocation7 + $0x30] sm:$0xff]  ;;  %v577_v10 = vld [vmem:[#allocation7 + $0x38] sm:$0xff]  ;;  %s759_s29 = sshll.u32 %s1738_s26, 4  ;;  %s741_s9 = scalar_lea.sflag [#allocation4], %s1543_s6  ;;  %s1748_s29 = int_to_ptr.vmem [resolvable:$true] %s759_s29 }
  0x70   : > { %1061 = vmatprep.subr.bf16.mxu0 %v1060_v3  ;;  %1092 = vmatprep.subr.bf16.mxu1 %v1060_v3  ;;  %v1068_v9 = vpack.c.bf16 %v575_v7, %v574_v6  ;;  %v283_v11 = vld [vmem:[%s1547_s7] sm:$0xff]  ;;  %v578_v13 = vld [vmem:[#allocation7 + $0x40] sm:$0xff]  ;;  %v579_v14 = vld [vmem:[#allocation7 + $0x48] sm:$0xff]  ;;  %v1072_v30 = vpack.c.bf16 %v577_v10, %v576_v8  ;;  %s1251_s10 = scalar_lea.vmem %s1748_s29, 1024  ;;  %p1851_p13 = scmp.ne.s32.totalorder %s1842_s27, 0 }
  0x71   : > { %1063 = vmatpush3.bf16.msra.mxu0 %v1060_v3  ;;  %1100 = vmatpush3.bf16.msra.mxu1 %v1060_v3  ;;  %v1558_v12 = vld [vmem:[#allocation5] ss:$0 sm:$0xff]  ;;  %v581_v16 = vld [vmem:[#allocation7 + $0x58] sm:$0xff]  ;;  %v1562_v19 = vld [vmem:[#allocation5 + $0x1] ss:$0 sm:$0xff]  ;;  %v1076_v40 = vpack.c.bf16 %v579_v14, %v578_v13  ;;  %p1252_p12 = scmp.ne.s32.totalorder %s1748_s29, %s1251_s10  ;;  %s1366_s12 = smov [#allocation8]  }
  0x72   : > { %1065 = vmatprep.subr.bf16.mxu0 %v1064_v5  ;;  %1093 = vmatprep.subr.bf16.mxu1 %v1064_v5  ;;  %v580_v15 = vld [vmem:[#allocation7 + $0x50] sm:$0xff]  ;;  %v298_v17 = vmul.f32 %v1558_v12, %v283_v11  ;;  %v582_v21 = vld [vmem:[#allocation7 + $0x60] sm:$0xff]  ;;  %v1566_v23 = vld [vmem:[#allocation5 + $0x2] ss:$0 sm:$0xff]  ;;  %s1255_s13 = sshll.u32 %s1366_s12, 4  ;;  %s1256_s13 = int_to_ptr.vmem [resolvable:$false] %s1255_s13 }
  0x73   : > { %v911_v18 = vld [vmem:[%s1547_s7 + $0x40] sm:$0xff]  ;;  %v583_v26 = vld [vmem:[#allocation7 + $0x68] sm:$0xff]  ;;  %v1583_v41 = vpack.c.bf16 %v581_v16, %v580_v15  ;;  %v284_v45 = vld [vmem:[%s1547_s7 + $0x8] sm:$0xff]  ;;  %p1253_p0 = pnand %p1252_p12, %p1851_p13  ;;  %s1257_s8 = scalar_lea.vmem %s1256_s13, 2048 }
  0x74   : > { %v920_v20 = vld [vmem:[%s1547_s7 + $0x80] sm:$0xff]  ;;  %v323_v22 = vmul.f32 %v1562_v19, %v911_v18  ;;  %v912_v46 = vld [vmem:[%s1547_s7 + $0x48] sm:$0xff]  ;;  %v1590_v47 = vpack.c.bf16 %v583_v26, %v582_v21  ;;  %v299_v48 = vmul.f32 %v1558_v12, %v284_v45  ;;  %v285_v63 = vld [vmem:[%s1547_s7 + $0x10] sm:$0xff]  ;;  %p1258_p8 = scmp.lt.s32.totalorder %s1748_s29, %s1256_s13  ;;  %p1259_p9 = scmp.lt.s32.totalorder %s1257_s8, %s1251_s10 }
  0x75   : > { %v929_v24 = vld [vmem:[%s1547_s7 + $0xc0] sm:$0xff]  ;;  %1067 = vmatpush3.bf16.msra.mxu0 %v1064_v5  ;;  %1101 = vmatpush3.bf16.msra.mxu1 %v1064_v5  ;;  %v356_v27 = vmul.f32 %v1566_v23, %v920_v20  ;;  %v324_v49 = vmul.f32 %v1562_v19, %v912_v46  ;;  %v921_v50 = vld [vmem:[%s1547_s7 + $0x88] sm:$0xff]  ;;  %v913_v0 = vld [vmem:[%s1547_s7 + $0x50] sm:$0xff]  ;;  %v300_v5 = vmul.f32 %v1558_v12, %v285_v63  ;;  %p1254_p7 = pneg %p1253_p0 }
  0x76   : > { %v1569_v25 = vld [vmem:[#allocation5 + $0x3] ss:$0 sm:$0xff]  ;;  %v1573_v29 = vld [vmem:[#allocation5 + $0x4] ss:$0 sm:$0xff]  ;;  %1069 = vmatprep.subr.bf16.mxu0 %v1068_v9  ;;  %1094 = vmatprep.subr.bf16.mxu1 %v1068_v9  ;;  %v584_v31 = vld [vmem:[#allocation7 + $0x70] sm:$0xff]  ;;  %v331_v33 = vadd.f32 %v323_v22, %v298_v17  ;;  %v357_v57 = vmul.f32 %v1566_v23, %v921_v50  ;;  %v325_v10 = vmul.f32 %v1562_v19, %v913_v0  ;;  %p1260_p10 = por %p1259_p9, %p1258_p8 }
  0x77   : > { %v938_v28 = vld [vmem:[%s1547_s7 + $0x100] sm:$0xff]  ;;  %v389_v34 = vmul.f32 %v1569_v25, %v929_v24  ;;  %v930_v51 = vld [vmem:[%s1547_s7 + $0xc8] sm:$0xff]  ;;  %v332_v60 = vadd.f32 %v324_v49, %v299_v48  ;;  %v922_v6 = vld [vmem:[%s1547_s7 + $0x90] sm:$0xff] }
  0x78   : > { %v585_v32 = vld [vmem:[#allocation7 + $0x78] sm:$0xff]  ;;  %v364_v42 = vadd.f32 %v356_v27, %v331_v33  ;;  %v422_v43 = vmul.f32 %v1573_v29, %v938_v28  ;;  %v390_v61 = vmul.f32 %v1569_v25, %v930_v51  ;;  %v931_v7 = vld [vmem:[%s1547_s7 + $0xd0] sm:$0xff]  ;;  %v358_v11 = vmul.f32 %v1566_v23, %v922_v6  ;;  %v286_v17 = vld [vmem:[%s1547_s7 + $0x18] sm:$0xff]  ;;  %p1261_p1 = pnand %p1260_p10, %p1254_p7 }
  0x79   : > { %v947_v35 = vld [vmem:[%s1547_s7 + $0x140] sm:$0xff]  ;;  %1071 = vmatpush3.bf16.msra.mxu0 %v1068_v9  ;;  %1102 = vmatpush3.bf16.msra.mxu1 %v1068_v9  ;;  %v939_v52 = vld [vmem:[%s1547_s7 + $0x108] sm:$0xff]  ;;  %v1602_v58 = vpack.c.bf16 %v585_v32, %v584_v31  ;;  %v365_v8 = vadd.f32 %v357_v57, %v332_v60  ;;  %v940_v13 = vld [vmem:[%s1547_s7 + $0x110] sm:$0xff]  ;;  %v333_v22 = vadd.f32 %v325_v10, %v300_v5 }
  0x7a   : > { %v1577_v36 = vld [vmem:[#allocation5 + $0x5] ss:$0 sm:$0xff]  ;;  %v1580_v38 = vld [vmem:[#allocation5 + $0x6] ss:$0 sm:$0xff]  ;;  %v1586_v44 = vld [vmem:[#allocation5 + $0x7] ss:$0 sm:$0xff]  ;;  %1073 = vmatprep.subr.bf16.mxu0 %v1072_v30  ;;  %1095 = vmatprep.subr.bf16.mxu1 %v1072_v30  ;;  %v397_v53 = vadd.f32 %v389_v34, %v364_v42  ;;  %v423_v3 = vmul.f32 %v1573_v29, %v939_v52  ;;  %v391_v24 = vmul.f32 %v1569_v25, %v931_v7 }
  0x7b   : > { %v956_v37 = vld [vmem:[%s1547_s7 + $0x180] sm:$0xff]  ;;  %v455_v54 = vmul.f32 %v1577_v36, %v947_v35  ;;  %v1599_v56 = vld [vmem:[#allocation5 + $0x8] ss:$0 sm:$0xff]  ;;  %v914_v18 = vld [vmem:[%s1547_s7 + $0x58] sm:$0xff]  ;;  %v398_v20 = vadd.f32 %v390_v61, %v365_v8  ;;  %v424_v31 = vmul.f32 %v1573_v29, %v940_v13  ;;  %v301_v32 = vmul.f32 %v1558_v12, %v286_v17 }
  0x7c   : > { %v965_v39 = vld [vmem:[%s1547_s7 + $0x1c0] sm:$0xff]  ;;  %v488_v59 = vmul.f32 %v1580_v38, %v956_v37  ;;  %v948_v62 = vld [vmem:[%s1547_s7 + $0x148] sm:$0xff]  ;;  %v430_v1 = vadd.f32 %v422_v43, %v397_v53  ;;  %v949_v26 = vld [vmem:[%s1547_s7 + $0x150] sm:$0xff]  ;;  %v366_v37 = vadd.f32 %v358_v11, %v333_v22  ;;  %v326_v42 = vmul.f32 %v1562_v19, %v914_v18 }
  0x7d   : > { %v974_v55 = vld [vmem:[%s1547_s7 + $0x200] sm:$0xff]  ;;  %v521_v2 = vmul.f32 %v1586_v44, %v965_v39  ;;  %v957_v4 = vld [vmem:[%s1547_s7 + $0x188] sm:$0xff]  ;;  %1075 = vmatpush3.bf16.msra.mxu0 %v1072_v30  ;;  %1103 = vmatpush3.bf16.msra.mxu1 %v1072_v30  ;;  %v456_v16 = vmul.f32 %v1577_v36, %v948_v62  ;;  %v923_v27 = vld [vmem:[%s1547_s7 + $0x98] sm:$0xff]  ;;  %v431_v34 = vadd.f32 %v423_v3, %v398_v20 }
  0x7e   : > { %v966_v9 = vld [vmem:[%s1547_s7 + $0x1c8] sm:$0xff]  ;;  %1077 = vmatprep.subr.bf16.mxu0 %v1076_v40  ;;  %1096 = vmatprep.subr.bf16.mxu1 %v1076_v40  ;;  %v463_v14 = vadd.f32 %v455_v54, %v430_v1  ;;  %v554_v15 = vmul.f32 %v1599_v56, %v974_v55  ;;  %v489_v21 = vmul.f32 %v1580_v38, %v957_v4  ;;  %v932_v33 = vld [vmem:[%s1547_s7 + $0xd8] sm:$0xff]  ;;  %v958_v39 = vld [vmem:[%s1547_s7 + $0x190] sm:$0xff] }
  0x7f   : > { %v522_v30 = vmul.f32 %v1586_v44, %v966_v9  ;;  %v975_v35 = vld [vmem:[%s1547_s7 + $0x208] sm:$0xff]  ;;  %v941_v43 = vld [vmem:[%s1547_s7 + $0x118] sm:$0xff]  ;;  %v457_v46 = vmul.f32 %v1577_v36, %v949_v26  ;;  %v464_v48 = vadd.f32 %v456_v16, %v431_v34  ;;  %v399_v49 = vadd.f32 %v391_v24, %v366_v37  ;;  %v967_v50 = vld [vmem:[%s1547_s7 + $0x1d0] sm:$0xff] }
  0x80   : > { %v496_v28 = vadd.f32 %v488_v59, %v463_v14  ;;  %v334_v51 = vadd.f32 %v326_v42, %v301_v32  ;;  %v392_v52 = vmul.f32 %v1569_v25, %v932_v33  ;;  %v287_v53 = vld [vmem:[%s1547_s7 + $0x20] sm:$0xff]  ;;  %v555_v57 = vmul.f32 %v1599_v56, %v975_v35  ;;  %v950_v61 = vld [vmem:[%s1547_s7 + $0x158] sm:$0xff]  ;;  %v976_v1 = vld [vmem:[%s1547_s7 + $0x210] sm:$0xff] }
  0x81   : > { %1079 = vmatpush3.bf16.msra.mxu0 %v1076_v40  ;;  %1104 = vmatpush3.bf16.msra.mxu1 %v1076_v40  ;;  %v359_v40 = vmul.f32 %v1566_v23, %v923_v27  ;;  %v915_v54 = vld [vmem:[%s1547_s7 + $0x60] sm:$0xff]  ;;  %v490_v59 = vmul.f32 %v1580_v38, %v958_v39  ;;  %v425_v60 = vmul.f32 %v1573_v29, %v941_v43  ;;  %v959_v5 = vld [vmem:[%s1547_s7 + $0x198] sm:$0xff]  ;;  %v288_v20 = vld [vmem:[%s1547_s7 + $0x28] sm:$0xff] }
  0x82   : > { %1081 = vmatprep.subr.bf16.mxu0 %v1583_v41  ;;  %1097 = vmatprep.subr.bf16.mxu1 %v1583_v41  ;;  %v529_v45 = vadd.f32 %v521_v2, %v496_v28  ;;  %v924_v62 = vld [vmem:[%s1547_s7 + $0xa0] sm:$0xff]  ;;  %v497_v63 = vadd.f32 %v489_v21, %v464_v48  ;;  %v432_v0 = vadd.f32 %v424_v31, %v399_v49  ;;  %v968_v10 = vld [vmem:[%s1547_s7 + $0x1d8] sm:$0xff]  ;;  %v916_v26 = vld [vmem:[%s1547_s7 + $0x68] sm:$0xff] }
  0x83   : > { %v367_v2 = vadd.f32 %v359_v40, %v334_v51  ;;  %v933_v3 = vld [vmem:[%s1547_s7 + $0xe0] sm:$0xff]  ;;  %v523_v4 = vmul.f32 %v1586_v44, %v967_v50  ;;  %v302_v6 = vmul.f32 %v1558_v12, %v287_v53  ;;  %v458_v9 = vmul.f32 %v1577_v36, %v950_v61  ;;  %v925_v27 = vld [vmem:[%s1547_s7 + $0xa8] sm:$0xff]  ;;  %v289_v49 = vld [vmem:[%s1547_s7 + $0x30] sm:$0xff] }
  0x84   : > { %v562_v55 = vadd.f32 %v554_v15, %v529_v45  ;;  %v465_v7 = vadd.f32 %v457_v46, %v432_v0  ;;  %v360_v11 = vmul.f32 %v1566_v23, %v924_v62  ;;  %v942_v13 = vld [vmem:[%s1547_s7 + $0x120] sm:$0xff]  ;;  %v530_v14 = vadd.f32 %v522_v30, %v497_v63  ;;  %v977_v30 = vld [vmem:[%s1547_s7 + $0x218] sm:$0xff]  ;;  %v934_v39 = vld [vmem:[%s1547_s7 + $0xe8] sm:$0xff] }
  0x85   : > { %1083 = vmatpush3.bf16.msra.mxu0 %v1583_v41  ;;  %1105 = vmatpush3.bf16.msra.mxu1 %v1583_v41  ;;  %v327_v41 = vmul.f32 %v1562_v19, %v915_v54  ;;  %v400_v8 = vadd.f32 %v392_v52, %v367_v2  ;;  %v556_v15 = vmul.f32 %v1599_v56, %v976_v1  ;;  %v951_v18 = vld [vmem:[%s1547_s7 + $0x160] sm:$0xff]  ;;  %v943_v48 = vld [vmem:[%s1547_s7 + $0x128] sm:$0xff]  ;;  %v917_v53 = vld [vmem:[%s1547_s7 + $0x70] sm:$0xff] }
  0x86   : > { %1085 = vmatprep.subr.bf16.mxu0 %v1590_v47  ;;  %1098 = vmatprep.subr.bf16.mxu1 %v1590_v47  ;;  %v393_v17 = vmul.f32 %v1569_v25, %v933_v3  ;;  %v498_v21 = vadd.f32 %v490_v59, %v465_v7  ;;  %v491_v24 = vmul.f32 %v1580_v38, %v959_v5  ;;  %v960_v35 = vld [vmem:[%s1547_s7 + $0x1a0] sm:$0xff]  ;;  %v926_v54 = vld [vmem:[%s1547_s7 + $0xb0] sm:$0xff]  ;;  %v952_v62 = vld [vmem:[%s1547_s7 + $0x168] sm:$0xff] }
  0x87   : > { %1048 = vmatprep.mubr.f32.mxu0 %v562_v55  ;;  %v335_v16 = vadd.f32 %v327_v41, %v302_v6  ;;  %v433_v22 = vadd.f32 %v425_v60, %v400_v8  ;;  %v524_v28 = vmul.f32 %v1586_v44, %v968_v10  ;;  %v459_v34 = vmul.f32 %v1577_v36, %v951_v18  ;;  %v969_v45 = vld [vmem:[%s1547_s7 + $0x1e0] sm:$0xff]  ;;  %v961_v1 = vld [vmem:[%s1547_s7 + $0x1a8] sm:$0xff]  ;;  %v935_v3 = vld [vmem:[%s1547_s7 + $0xf0] sm:$0xff] }
  0x88   : > { %v531_v32 = vadd.f32 %v523_v4, %v498_v21  ;;  %v303_v37 = vmul.f32 %v1558_v12, %v288_v20  ;;  %v563_v42 = vadd.f32 %v555_v57, %v530_v14  ;;  %v328_v46 = vmul.f32 %v1562_v19, %v916_v26  ;;  %v978_v59 = vld [vmem:[%s1547_s7 + $0x220] sm:$0xff]  ;;  %v944_v7 = vld [vmem:[%s1547_s7 + $0x130] sm:$0xff]  ;;  %v290_v8 = vld [vmem:[%s1547_s7 + $0x38] sm:$0xff] }
  0x89   : > { %1087 = vmatpush3.bf16.msra.mxu0 %v1590_v47  ;;  %1106 = vmatpush3.bf16.msra.mxu1 %v1590_v47  ;;  %v368_v31 = vadd.f32 %v360_v11, %v335_v16  ;;  %v426_v47 = vmul.f32 %v1573_v29, %v942_v13  ;;  %v466_v33 = vadd.f32 %v458_v9, %v433_v22  ;;  %v918_v9 = vld [vmem:[%s1547_s7 + $0x78] sm:$0xff]  ;;  %v953_v26 = vld [vmem:[%s1547_s7 + $0x170] sm:$0xff] }
  0x8a   : > { %1089 = vmatprep.subr.bf16.mxu0 %v1602_v58  ;;  %1099 = vmatprep.subr.bf16.mxu1 %v1602_v58  ;;  %v361_v40 = vmul.f32 %v1566_v23, %v925_v27  ;;  %v564_v50 = vadd.f32 %v556_v15, %v531_v32  ;;  %v557_v52 = vmul.f32 %v1599_v56, %v977_v30  ;;  %v927_v14 = vld [vmem:[%s1547_s7 + $0xb8] sm:$0xff] }
  0x8b   : > { %v401_v43 = vadd.f32 %v393_v17, %v368_v31  ;;  %v499_v51 = vadd.f32 %v491_v24, %v466_v33  ;;  %v492_v57 = vmul.f32 %v1580_v38, %v960_v35  ;;  %v336_v60 = vadd.f32 %v328_v46, %v303_v37  ;;  %v970_v17 = vld [vmem:[%s1547_s7 + $0x1e8] sm:$0xff]  ;;  %v936_v21 = vld [vmem:[%s1547_s7 + $0xf8] sm:$0xff]  ;;  %v962_v37 = vld [vmem:[%s1547_s7 + $0x1b0] sm:$0xff] }
  0x8c   : > { %v394_v61 = vmul.f32 %v1569_v25, %v934_v39  ;;  %v427_v0 = vmul.f32 %v1573_v29, %v943_v48  ;;  %v304_v2 = vmul.f32 %v1558_v12, %v289_v49  ;;  %v329_v6 = vmul.f32 %v1562_v19, %v917_v53  ;;  %v945_v33 = vld [vmem:[%s1547_s7 + $0x138] sm:$0xff]  ;;  %v979_v35 = vld [vmem:[%s1547_s7 + $0x228] sm:$0xff]  ;;  %v980_v53 = vld [vmem:[%s1547_s7 + $0x230] sm:$0xff] }
  0x8d   : > { %1091 = vmatpush3.bf16.msra.mxu0 %v1602_v58  ;;  %1107 = vmatpush3.bf16.msra.mxu1 %v1602_v58  ;;  %v434_v55 = vadd.f32 %v426_v47, %v401_v43  ;;  %v532_v63 = vadd.f32 %v524_v28, %v499_v51  ;;  %v525_v58 = vmul.f32 %v1586_v44, %v969_v45  ;;  %v954_v46 = vld [vmem:[%s1547_s7 + $0x178] sm:$0xff] }
  0x8e   : > { %v369_v5 = vadd.f32 %v361_v40, %v336_v60  ;;  %v362_v41 = vmul.f32 %v1566_v23, %v926_v54  ;;  %v558_v11 = vmul.f32 %v1599_v56, %v978_v59  ;;  %v460_v13 = vmul.f32 %v1577_v36, %v952_v62  ;;  %v971_v40 = vld [vmem:[%s1547_s7 + $0x1f0] sm:$0xff] }
  0x8f   : > { %v467_v4 = vadd.f32 %v459_v34, %v434_v55  ;;  %v565_v10 = vadd.f32 %v557_v52, %v532_v63  ;;  %v337_v18 = vadd.f32 %v329_v6, %v304_v2  ;;  %v395_v20 = vmul.f32 %v1569_v25, %v935_v3 }
  0x90   : > { %1049 = vmatmul.mubr.f32.vlgmr.msra.gmra.mrb[0].mxu0 %v563_v42  ;;  %v402_v16 = vadd.f32 %v394_v61, %v369_v5  ;;  %v493_v22 = vmul.f32 %v1580_v38, %v961_v1  ;;  %v428_v24 = vmul.f32 %v1573_v29, %v944_v7  ;;  %v305_v27 = vmul.f32 %v1558_v12, %v290_v8  ;;  %v972_v61 = vld [vmem:[%s1547_s7 + $0x1f8] sm:$0xff] }
  0x91   : > { %1051 = vmatprep.mubr.f32.mxu0 %v564_v50  ;;  %v500_v15 = vadd.f32 %v492_v57, %v467_v4  ;;  %v330_v28 = vmul.f32 %v1562_v19, %v918_v9  ;;  %v370_v47 = vadd.f32 %v362_v41, %v337_v18  ;;  %v363_v32 = vmul.f32 %v1566_v23, %v927_v14  ;;  %v981_v1 = vld [vmem:[%s1547_s7 + $0x238] sm:$0xff] }
  0x92   : > { %v435_v31 = vadd.f32 %v427_v0, %v402_v16  ;;  %v526_v34 = vmul.f32 %v1586_v44, %v970_v17  ;;  %v396_v12 = vmul.f32 %v1569_v25, %v936_v21  ;;  %v461_v45 = vmul.f32 %v1577_v36, %v953_v26  ;;  %v963_v25 = vld [vmem:[%s1547_s7 + $0x1b8] sm:$0xff] }
  0x93   : > { %v533_v30 = vadd.f32 %v525_v58, %v500_v15  ;;  %v338_v39 = vadd.f32 %v330_v28, %v305_v27  ;;  %v403_v43 = vadd.f32 %v395_v20, %v370_v47  ;;  %v429_v23 = vmul.f32 %v1573_v29, %v945_v33 }
  0x94   : > { %1052 = vmatmul.mubr.f32.gmra.mrb[2].mxu0 %v565_v10  ;;  %v468_v19 = vadd.f32 %v460_v13, %v435_v31  ;;  %v559_v50 = vmul.f32 %v1599_v56, %v979_v35  ;;  %v494_v52 = vmul.f32 %v1580_v38, %v962_v37  ;;  %v462_v55 = vmul.f32 %v1577_v36, %v954_v46 }
  0x95   : > { %v566_v42 = vadd.f32 %v558_v11, %v533_v30  ;;  %v371_v48 = vadd.f32 %v363_v32, %v338_v39  ;;  %v436_v51 = vadd.f32 %v428_v24, %v403_v43  ;;  %v527_v60 = vmul.f32 %v1586_v44, %v971_v40 }
  0x96   : > { %v501_v49 = vadd.f32 %v493_v22, %v468_v19  ;;  %v495_v29 = vmul.f32 %v1580_v38, %v963_v25  ;;  %v560_v0 = vmul.f32 %v1599_v56, %v980_v53  ;;  %v528_v3 = vmul.f32 %v1586_v44, %v972_v61 }
  0x97   : > { %1054 = vmatprep.mubr.f32.mxu1 %v566_v42  ;;  %v404_v54 = vadd.f32 %v396_v12, %v371_v48  ;;  %v469_v59 = vadd.f32 %v461_v45, %v436_v51  ;;  %v561_v5 = vmul.f32 %v1599_v56, %v981_v1 }
  0x98   : > { %v534_v57 = vadd.f32 %v526_v34, %v501_v49 }
  0x99   : > { %v437_v62 = vadd.f32 %v429_v23, %v404_v54  ;;  %v502_v58 = vadd.f32 %v494_v52, %v469_v59 }
  0x9a   : > { %v567_v63 = vadd.f32 %v559_v50, %v534_v57 }
  0x9b   : > { %v470_v2 = vadd.f32 %v462_v55, %v437_v62  ;;  %v535_v4 = vadd.f32 %v527_v60, %v502_v58 }
  0x9c   : > { %1055 = vmatmul.mubr.f32.vlgmr.msra.gmra.mrb[0].mxu1 %v567_v63 }
  0x9d   : > { %v503_v36 = vadd.f32 %v495_v29, %v470_v2  ;;  %v568_v6 = vadd.f32 %v560_v0, %v535_v4 }
  0x9f   : > { %v536_v41 = vadd.f32 %v528_v3, %v503_v36  ;;  %1057 = vmatprep.mubr.f32.mxu1 %v568_v6 }
  0xa1   : > { %v569_v7 = vadd.f32 %v561_v5, %v536_v41 }
  0xa3   : > { %1058 = vmatmul.mubr.f32.gmra.mrb[2].mxu1 %v569_v7 }
 0x163   : > { %v1050_v38 = vpop.f32.mrb[0].mxu0 }
 0x164   : > { %692 = vst [vmem:[%s1738_s26 + $0x8] sm:$0xff] %v1050_v38  ;;  %v713_v44 = vmul.f32 %v1050_v38, %v1050_v38  ;;  %v652_v8 = vpop.f32.mrb[1].mxu0 }
 0x165   : > { %691 = vst [vmem:[%s1738_s26] sm:$0xff] %v652_v8  ;;  %v699_v9 = vadd.f32 %v1050_v38, %v652_v8  ;;  %v712_v56 = vmul.f32 %v652_v8, %v652_v8 }
 0x167   : > { %v720_v10 = vadd.f32 %v713_v44, %v712_v56  ;;  %v1053_v11 = vpop.f32.mrb[2].mxu0 }
 0x168   : > { %694 = vst [vmem:[%s1738_s26 + $0x18] sm:$0xff] %v1053_v11  ;;  %v662_v13 = vpop.f32.mrb[3].mxu0  ;;  %v715_v16 = vmul.f32 %v1053_v11, %v1053_v11 }
 0x169   : > { %693 = vst [vmem:[%s1738_s26 + $0x10] sm:$0xff] %v662_v13  ;;  %v700_v14 = vadd.f32 %v699_v9, %v662_v13  ;;  %v714_v15 = vmul.f32 %v662_v13, %v662_v13 }
 0x16b   : > { %v701_v17 = vadd.f32 %v1053_v11, %v700_v14  ;;  %v721_v18 = vadd.f32 %v720_v10, %v714_v15 }
 0x16d   : > { %v722_v20 = vadd.f32 %v721_v18, %v715_v16 }
 0x16f   : > { %v1056_v21 = vpop.f32.mrb[0].mxu1 }
 0x170   : > { %696 = vst [vmem:[%s1738_s26 + $0x28] sm:$0xff] %v1056_v21  ;;  %v672_v22 = vpop.f32.mrb[1].mxu1  ;;  %v717_v27 = vmul.f32 %v1056_v21, %v1056_v21 }
 0x171   : > { %695 = vst [vmem:[%s1738_s26 + $0x20] sm:$0xff] %v672_v22  ;;  %v702_v24 = vadd.f32 %v701_v17, %v672_v22  ;;  %v716_v26 = vmul.f32 %v672_v22, %v672_v22 }
 0x173   : > { %v723_v28 = vadd.f32 %v722_v20, %v716_v26  ;;  %v703_v30 = vadd.f32 %v1056_v21, %v702_v24 }
 0x175   : > { %v724_v31 = vadd.f32 %v723_v28, %v717_v27 }
 0x176   : > { %v1059_v47 = vpop.f32.mrb[2].mxu1 }
 0x177   : > { %698 = vst [vmem:[%s1738_s26 + $0x38] sm:$0xff] %v1059_v47  ;;  %v682_v32 = vpop.f32.mrb[3].mxu1 }
 0x178   : > { %697 = vst [vmem:[%s1738_s26 + $0x30] sm:$0xff] %v682_v32  ;;  %v704_v33 = vadd.f32 %v703_v30, %v682_v32  ;;  %v718_v34 = vmul.f32 %v682_v32, %v682_v32 }
 0x179   : > { %1264 = shalt.err (!%p1261_p1)
}
 0x17a   : > { %s1265_s20 = scalar_lea.hbm %s1753_s5, 1024  ;;  %s1269_s7 = scalar_lea.hbm %s1833_s3, 2048 }
 0x17b   : > { %p1266_p3 = scmp.ne.s32.totalorder %s1753_s5, %s1265_s20  ;;  %p1270_p6 = scmp.lt.u32.totalorder %s1753_s5, %s1833_s3 }
 0x17c   : > { %p1271_p11 = scmp.lt.u32.totalorder %s1269_s7, %s1265_s20  ;;  %p1273_p0 = scmp.lt.u32.totalorder %s1265_s20, %s1753_s5 }
 0x17d   : > { %p1267_p2 = pnand %p1266_p3, %p1851_p13 }
 0x17e   : > { %p1272_p12 = por %p1271_p11, %p1270_p6 }
 0x17f   : > { %p1268_p5 = pneg %p1267_p2 }
 0x180   : > { %p1274_p7 = por %p1273_p0, %p1272_p12 }
 0x182   : > { %p1275_p8 = pnand %p1274_p7, %p1268_p5 }
 0x184   : > { %1278 = shalt.err (!%p1275_p8)
}
 0x185   : > { %s1367_s11 = smov 128   ;;  %s1368_s14 = smov 8   ;;  %v719_v35 = vmul.f32 %v1059_v47, %v1059_v47  ;;  %v705_v37 = vadd.f32 %v1059_v47, %v704_v33  ;;  %v725_v39 = vadd.f32 %v724_v31, %v718_v34  ;;  %v733_v45 = vlaneseq }
 0x186   : > { %1127 = dma.vmem_to_hbm [thread:$0]  (%p1851_p13), %s1748_s29, 1024, %s1753_s5, %s741_s9, %s1367_s11, %s1367_s11, %s1368_s14  }
 0x187   : > { %v706_v12 = vrot.slane %v705_v37, 4  ;;  %v726_v42 = vadd.f32 %v725_v39, %v719_v35  ;;  %s909_s22 = sshll.u32 %s1543_s6, 3  ;;  %v734_v49 = vshrl.u32 %v733_v45, 7  ;;  %s987_s29 = sshll.u32 %s1416_s19, 7 }
 0x188   : > { %s280_s5 = scalar_lea.vmem [#allocation9], %s909_s22  ;;  %s1786_s13 = scalar_lea.hbm %s1834_s4, %s987_s29 }
 0x189   : > { %v707_v19 = vadd.f32 %v706_v12, %v705_v37  ;;  %v727_v43 = vrot.slane %v726_v42, 4  ;;  %vm736_vm0 = vcmp.eq.s32.totalorder %v734_v49, 1  ;;  %s775_s9 = sshll.u32 %s280_s5, 4  ;;  %vm735_vm1 = vcmp.eq.s32.totalorder %v734_v49, 0  ;;  %s746_s8 = scalar_lea.sflag [#allocation10], %s1543_s6  ;;  %s1788_s9 = int_to_ptr.vmem [resolvable:$true] %s775_s9 }
 0x18a   : > { %s1279_s19 = scalar_lea.vmem %s1788_s9, 128  ;;  %s1369_s20 = smov [#allocation9]  }
 0x18b   : > { %v708_v46 = vrot.slane %v707_v19, 2  ;;  %v728_v40 = vadd.f32 %v727_v43, %v726_v42  ;;  %p1280_p9 = scmp.ne.s32.totalorder %s1788_s9, %s1279_s19  ;;  %s1283_s23 = sshll.u32 %s1369_s20, 4  ;;  %s1284_s23 = int_to_ptr.vmem [resolvable:$false] %s1283_s23 }
 0x18c   : > { %s1285_s30 = scalar_lea.vmem %s1284_s23, 256  ;;  %p1286_p3 = scmp.lt.s32.totalorder %s1788_s9, %s1284_s23 }
 0x18d   : > { %v709_v48 = vadd.f32 %v708_v46, %v707_v19  ;;  %v729_v23 = vrot.slane %v728_v40, 2  ;;  %p1281_p10 = pnand %p1280_p9, %p1851_p13  ;;  %p1287_p2 = scmp.lt.s32.totalorder %s1285_s30, %s1279_s19 }
 0x18f   : > { %v730_v50 = vadd.f32 %v729_v23, %v728_v40  ;;  %v710_v51 = vrot.slane %v709_v48, 1  ;;  %p1282_p1 = pneg %p1281_p10  ;;  %p1288_p5 = por %p1287_p2, %p1286_p3 }
 0x191   : > { %v731_v52 = vrot.slane %v730_v50, 1  ;;  %v711_v53 = vadd.f32 %v710_v51, %v709_v48  ;;  %p1289_p6 = pnand %p1288_p5, %p1282_p1 }
 0x193   : > { %v732_v25 = vadd.f32 %v731_v52, %v730_v50 }
 0x195   : > { %v737_v54 = vsel %vm736_vm0, %v732_v25, 0.0 }
 0x196   : > { %v738_v55 = vsel %vm735_vm1, %v711_v53, %v737_v54 }
 0x197   : > { %739 = vst [vmem:[%s280_s5] sm:$0xff] %v738_v55 }
 0x198   : > { %1292 = shalt.err (!%p1289_p6)
}
 0x199   : > { %s1293_s6 = scalar_lea.hbm %s1786_s13, 128  ;;  %s1297_s26 = scalar_lea.hbm %s1834_s4, 256 }
 0x19a   : > { %p1294_p11 = scmp.ne.s32.totalorder %s1786_s13, %s1293_s6  ;;  %p1298_p7 = scmp.lt.u32.totalorder %s1786_s13, %s1834_s4 }
 0x19b   : > { %p1299_p8 = scmp.lt.u32.totalorder %s1297_s26, %s1293_s6  ;;  %p1301_p10 = scmp.lt.u32.totalorder %s1293_s6, %s1786_s13 }
 0x19c   : > { %p1295_p12 = pnand %p1294_p11, %p1851_p13 }
 0x19d   : > { %p1300_p9 = por %p1299_p8, %p1298_p7 }
 0x19e   : > { %p1296_p0 = pneg %p1295_p12 }
 0x19f   : > { %p1302_p1 = por %p1301_p10, %p1300_p9 }
 0x1a1   : > { %p1303_p3 = pnand %p1302_p1, %p1296_p0 }
 0x1a3   : > { %1306 = shalt.err (!%p1303_p3)
}
 0x1a4   : > { %1128 = dma.vmem_to_hbm [thread:$0]  (%p1851_p13), %s1788_s9, 128, %s1786_s13, %s746_s8  }
 0x1a5 PF: > { %s787_s22 = sand.u32 1, %s1341_s15   ;;  %p1852_p2 = scmp.ne.s32.totalorder %s1843_s28, 0 }
 0x1a6   : > { %s788_s29 = scalar_lea.sflag [#allocation4], %s787_s22 }
 0x1a7   : > { %p1139_p5 = pnand %p900_p4, %p1852_p2 }
 0x1a9   : > { %1332 = dma.done.wait (!%p1139_p5), %s788_s29, 1024  }
 0x1aa   : > { %1334 = vsyncadd (!%p1139_p5), %s788_s29, 4294966272  ;;  %s797_s5 = scalar_lea.sflag [#allocation10], %s787_s22 }
 0x1ab   : > { %1336 = dma.done.wait (!%p1139_p5), %s797_s5, 128  }
 0x1ac   : > { %1338 = vsyncadd (!%p1139_p5), %s797_s5, 4294967168  ;;  %p22_p13 = scmp.ge.s32.totalorder %s1420_s21, 4   ;;  %s1853_s15 = smov %s1345_s16 }
 0x1ad   : > { %s1854_s16 = smov %s1349_s17  ;;  %s1855_s17 = smov %s1432_s24 }
 0x1ae   : > { %s1856_s18 = smov %s1420_s21  ;;  %24 = sbr.rel (!%p22_p13) target bundleno = 8 (0x8), region = 123 }
 0x1b5   :  { %802 = vsyncpa [#allocation3], 1 }
 0x1b6   :  { %804 = vsyncpa [#allocation3 + $0x1], 1 }
 0x1b7   :  { %805 = vsyncpa [#allocation6], 1 }
 0x1b8   :  { %806 = vsyncpa [#allocation4], 1 }
 0x1b9   :  { %808 = vsyncpa [#allocation4 + $0x1], 1 }
 0x1ba   :  { %809 = vsyncpa [#allocation10], 1 }
 0x1bb   :  { %811 = vsyncpa [#allocation10 + $0x1], 1 }

</bundles_post_ra>
